<compile_context>
chip_gen: v5e
topology: v5e:2x2
jax: 0.10.0
libtpu: 0.0.40
codegen_flags: <defaults>
</compile_context>

<pallas_src>
import jax
import jax.numpy as jnp
from jax import lax
from jax.experimental import pallas as pl
from jax.experimental.pallas import tpu as pltpu

_LANE = 128


def _round_up(x, m):
    return ((x + m - 1) // m) * m


def _vmem_capacity_bytes():
    """Per-core VMEM capacity; targeted fallback if the query is unavailable."""
    try:
        info = pltpu.get_tpu_info()
        cap = getattr(info, "vmem_capacity_bytes", None)
        if cap:
            return max(int(cap), 64 * 1024 * 1024)
    except Exception:
        pass
    return 64 * 1024 * 1024  # conservative (v7x per-TensorCore)


def _attn_pointer_kernel(x1_ref, x2_ref, w1t_ref, w2t_ref, vt_ref, o_ref, acc_ref):
    """One (row-tile i, hidden-chunk j) grid step.

    x1_ref/x2_ref  : (tm, H)   input rows (unpadded hidden as the K dim)
    w1t_ref/w2t_ref: (H, tn)   column slab of the pre-transposed weights
    vt_ref         : (1, tn)   matching slab of vt (zero-padded, exact)
    o_ref          : (1, tm)   lane-dense scores for this row tile
    acc_ref        : (1, tm)   f32 accumulator across hidden chunks
    """
    j = pl.program_id(1)

    @pl.when(j == 0)
    def _():
        acc_ref[...] = jnp.zeros_like(acc_ref)

    cd = w1t_ref.dtype  # MXU compute dtype (bf16 by default)
    wx1 = jnp.dot(x1_ref[...].astype(cd), w1t_ref[...],
                  preferred_element_type=jnp.float32)
    wx2 = jnp.dot(x2_ref[...].astype(cd), w2t_ref[...],
                  preferred_element_type=jnp.float32)
    h = jnp.tanh(wx1 + wx2).astype(cd)  # (tm, tn)

    # Lane-dense final projection: contract the hidden chunk on both operands
    # ("NT" matmul) -> (1, tm), so the final store is a dense full-lane vst.
    # TODO(synk): per perf review, verify via pl.lower_as_mlir that Mosaic does
    # not insert a per-step XLU transpose of h here; if it does, switch to
    # jnp.dot(h, vt_col) with a (tm, 1) accumulator and one final transpose.
    u = lax.dot_general(
        vt_ref[...], h,
        dimension_numbers=(((1,), (1,)), ((), ())),
        preferred_element_type=jnp.float32,
    )  # (1, tm)
    acc_ref[...] += u

    @pl.when(j == pl.num_programs(1) - 1)
    def _():
        o_ref[...] = acc_ref[...].astype(o_ref.dtype)


def prepare_attention_pointer_params(w1, w2, vt, compute_dtype=jnp.bfloat16):
    """One-time weight prep, hoisted out of the per-call path.

    Converts torch-style (out, in) weights to (in, out) layout, casts to the
    MXU compute dtype (bf16 by default), and zero-pads only the *output* (N)
    dim up to a lane multiple.  Padding is exact: padded weight columns give
    tanh(0)=0 and padded vt entries are 0.  The input (K) dim stays unpadded
    so x1/x2 never need padded HBM copies.
    """
    h = w1.shape[0]
    hp = _round_up(max(h, _LANE), _LANE)
    w1t = w1.T.astype(compute_dtype)
    w2t = w2.T.astype(compute_dtype)
    vtr = vt.reshape(1, h).astype(compute_dtype)
    if hp != h:
        w1t = jnp.zeros((h, hp), compute_dtype).at[:, :h].set(w1t)
        w2t = jnp.zeros((h, hp), compute_dtype).at[:, :h].set(w2t)
        vtr = jnp.zeros((1, hp), compute_dtype).at[:, :h].set(vtr)
    return w1t, w2t, vtr


def _vmem_estimate(tm, tn, h, xbytes, cbytes, obytes):
    """Footprint estimate incl. (tm, tn) intermediates + compiler scratch."""
    x_tiles = 2 * 2 * tm * h * xbytes            # x1 + x2, double-buffered
    w_tiles = 2 * 2 * h * tn * cbytes            # W1^T + W2^T slabs, double-buffered
    vt_tile = 2 * tn * cbytes
    out_tiles = 2 * 8 * tm * obytes              # (1, tm) blocks pad to 8 sublanes
    acc = 8 * tm * 4
    inter = 3 * tm * tn * 4 + tm * tn * cbytes + 2 * tm * h * cbytes  # wx1/wx2/sum, h, x casts
    return x_tiles + w_tiles + vt_tile + out_tiles + acc + inter + (2 << 20)


def _choose_tiles(m, h, hp, xbytes, cbytes, obytes, tm, tn, capacity):
    max_limit = (capacity * 3) // 4            # scoped-VMEM ceiling we will request
    budget = int(max_limit * 0.85)             # leave slack under that ceiling

    if tn is None:
        # Largest lane-aligned divisor of Hp whose double-buffered weight slabs
        # fit half the budget; tn == hp means the weights stay fully resident
        # (no per-row-tile re-streaming, reduction grid collapses to 1).
        cands = [hp // d for d in range(1, hp // _LANE + 1)
                 if hp % d == 0 and (hp // d) % _LANE == 0]
        tn = _LANE
        for cand in cands:  # descending
            if 2 * 2 * h * cand * cbytes + 2 * cand * cbytes <= budget // 2:
                tn = cand
                break
    assert tn % _LANE == 0 and hp % tn == 0, (tn, hp)

    if tm is None:
        m_cap = _round_up(max(m, 1), _LANE)
        tm = _LANE
        for cand in (2048, 1024, 512, 256, 128):   # big tiles for small H (mem-bound)
            if cand > m_cap:
                continue
            if _vmem_estimate(cand, tn, h, xbytes, cbytes, obytes) <= budget:
                tm = cand
                break
        # v7x megacore: make sure the "parallel" row axis has >= 2 tiles.
        while tm > _LANE and pl.cdiv(m, tm) < 2:
            tm //= 2
    tm = max(_LANE, _round_up(tm, _LANE))
    # TODO(synk): for H so large that even tm=128 with double-buffered (tm, H)
    # x tiles exceeds the budget, additionally tile the K (input-hidden) dim of
    # the first two matmuls (third grid axis) instead of spilling.
    return tm, tn, max_limit


def attention_pointer(x1, x2, params, *, tm=None, tn=None):
    """x1, x2: (B, S, H).  params: output of prepare_attention_pointer_params."""
    w1t, w2t, vtp = params
    B, S, H = x1.shape
    hp = w1t.shape[1]
    M = B * S

    xbytes = jnp.dtype(x1.dtype).itemsize
    cbytes = jnp.dtype(w1t.dtype).itemsize
    obytes = jnp.dtype(x1.dtype).itemsize
    capacity = _vmem_capacity_bytes()
    tm, tn, max_limit = _choose_tiles(M, H, hp, xbytes, cbytes, obytes, tm, tn, capacity)

    grid = (pl.cdiv(M, tm), hp // tn)
    mp = grid[0] * tm

    # No padded HBM copies of the inputs: the ragged last row tile is handled
    # by Pallas boundary masking (rows >= M land in output padding and are
    # sliced off below); reshape of a contiguous array is free.
    x1f = x1.reshape(M, H)
    x2f = x2.reshape(M, H)

    est = _vmem_estimate(tm, tn, H, xbytes, cbytes, obytes)
    # Always set the scoped VMEM limit (v5e default is only 16 MiB), capped at
    # 75% of this generation's capacity (48 MiB on v7x, 96 MiB on v5e/v6e).
    vmem_limit = int(min(max(int(est * 1.3), 32 * 1024 * 1024), max_limit))

    in_specs = [
        pl.BlockSpec((tm, H), lambda i, j: (i, 0)),   # x1 rows
        pl.BlockSpec((tm, H), lambda i, j: (i, 0)),   # x2 rows
        pl.BlockSpec((H, tn), lambda i, j: (0, j)),   # W1^T slab
        pl.BlockSpec((H, tn), lambda i, j: (0, j)),   # W2^T slab
        pl.BlockSpec((1, tn), lambda i, j: (0, j)),   # vt slab
    ]
    out_specs = pl.BlockSpec((1, tm), lambda i, j: (0, i))   # lane-dense scores

    out = pl.pallas_call(
        _attn_pointer_kernel,
        out_shape=jax.ShapeDtypeStruct((1, mp), x1.dtype),
        grid_spec=pltpu.PrefetchScalarGridSpec(
            num_scalar_prefetch=0,
            grid=grid,
            in_specs=in_specs,
            out_specs=out_specs,
            scratch_shapes=[pltpu.VMEM((1, tm), jnp.float32)],
        ),
        compiler_params=pltpu.CompilerParams(
            dimension_semantics=("parallel", "arbitrary"),
            vmem_limit_bytes=vmem_limit,
        ),
    )(x1f, x2f, w1t, w2t, vtp)

    return out[0, :M].reshape(B, S)


def _reference(x1, x2, w1, w2, vt):
    wx1 = jnp.einsum("bsh,oh->bso", x1, w1)
    wx2 = jnp.einsum("bsh,oh->bso", x2, w2)
    return jnp.einsum("bsh,oh->bso", jnp.tanh(wx1 + wx2), vt)[..., 0]


if __name__ == "__main__":
    B, S, H = 2, 8, 32
    key = jax.random.PRNGKey(0)
    k1, k2, kw1, kw2, kv = jax.random.split(key, 5)

    x1 = jax.random.normal(k1, (B, S, H), dtype=jnp.float32)
    x2 = jax.random.normal(k2, (B, S, H), dtype=jnp.float32)

    # nn.Linear default init: U(-1/sqrt(in), 1/sqrt(in)), torch (out, in) layout.
    bound = 1.0 / jnp.sqrt(jnp.float32(H))
    w1 = jax.random.uniform(kw1, (H, H), minval=-bound, maxval=bound, dtype=jnp.float32)
    w2 = jax.random.uniform(kw2, (H, H), minval=-bound, maxval=bound, dtype=jnp.float32)
    vt = jax.random.uniform(kv, (1, H), minval=-bound, maxval=bound, dtype=jnp.float32)

    ref = _reference(x1, x2, w1, w2, vt)

    # Default (bf16 MXU) path — relaxed tolerance vs. the f32 reference.
    params = prepare_attention_pointer_params(w1, w2, vt)
    u = jax.block_until_ready(attention_pointer(x1, x2, params))
    assert u.shape == (B, S), u.shape
    max_err = float(jnp.max(jnp.abs(u - ref)))
    assert max_err < 2e-2, max_err

    # Full-precision path sanity check (also validates ragged-tile handling).
    params32 = prepare_attention_pointer_params(w1, w2, vt, compute_dtype=jnp.float32)
    u32 = jax.block_until_ready(attention_pointer(x1, x2, params32))
    max_err32 = float(jnp.max(jnp.abs(u32 - ref)))
    assert jnp.allclose(u32, ref, atol=2e-5, rtol=2e-5), max_err32

    print("KERNEL_OK")
</pallas_src>

<mosaic_0001>
module attributes {stable_mosaic.version = 11 : i64} {
  func.func @_attn_pointer_kernel(%arg0: i32, %arg1: i32, %arg2: memref<128x32xf32, #tpu.memory_space<vmem>>, %arg3: memref<128x32xf32, #tpu.memory_space<vmem>>, %arg4: memref<32x128xbf16, #tpu.memory_space<vmem>>, %arg5: memref<32x128xbf16, #tpu.memory_space<vmem>>, %arg6: memref<1x128xbf16, #tpu.memory_space<vmem>>, %arg7: memref<1x128xf32, #tpu.memory_space<vmem>>, %arg8: memref<1x128xf32, #tpu.memory_space<vmem>>) attributes {dimension_semantics = [#tpu.dimension_semantics<parallel>, #tpu.dimension_semantics<arbitrary>], iteration_bounds = array<i64: 1, 1>, scalar_prefetch = 0 : i64, scratch_operands = 1 : i64, tpu.core_type = #tpu.core_type<tc>, window_params = [{transform_indices = @transform_0, window_bounds = array<i64: 128, 32>}, {transform_indices = @transform_1, window_bounds = array<i64: 128, 32>}, {transform_indices = @transform_2, window_bounds = array<i64: 32, 128>}, {transform_indices = @transform_3, window_bounds = array<i64: 32, 128>}, {transform_indices = @transform_4, window_bounds = array<i64: 1, 128>}, {transform_indices = @transform_5, window_bounds = array<i64: 1, 128>}]} {
    %c0_i32 = arith.constant 0 : i32
    %0 = arith.cmpi eq, %arg1, %c0_i32 : i32
    %1 = arith.extui %0 : i1 to i32
    %c0_i32_0 = arith.constant 0 : i32
    %2 = arith.cmpi ne, %1, %c0_i32_0 : i32
    scf.if %2 {
      %cst_18 = arith.constant 0.000000e+00 : f32
      %22 = vector.broadcast %cst_18 : f32 to vector<1x128xf32>
      %c0_19 = arith.constant 0 : index
      %c0_20 = arith.constant 0 : index
      %23 = vector.load %arg8[%c0_19, %c0_20] : memref<1x128xf32, #tpu.memory_space<vmem>>, vector<1x128xf32>
      tpu.vector_store %arg8[%c0_19, %c0_20], %22 {strides = array<i32>} : memref<1x128xf32, #tpu.memory_space<vmem>>, vector<1x128xf32>,
    } else {
    }
    %c0 = arith.constant 0 : index
    %c0_1 = arith.constant 0 : index
    %3 = vector.load %arg2[%c0, %c0_1] : memref<128x32xf32, #tpu.memory_space<vmem>>, vector<128x32xf32>
    %4 = arith.truncf %3 : vector<128x32xf32> to vector<128x32xbf16>
    %c0_2 = arith.constant 0 : index
    %c0_3 = arith.constant 0 : index
    %5 = vector.load %arg4[%c0_2, %c0_3] : memref<32x128xbf16, #tpu.memory_space<vmem>>, vector<32x128xbf16>
    %cst = arith.constant dense<0.000000e+00> : vector<128x128xf32>
    %6 = tpu.matmul %4, %5, %cst {dimension_numbers = #tpu.dot_dimension_numbers<[1], [0], [0], [1], [0, 0, 1, 1], [], []>} : vector<128x32xbf16>, vector<32x128xbf16>, vector<128x128xf32> -> vector<128x128xf32>
    %c0_4 = arith.constant 0 : index
    %c0_5 = arith.constant 0 : index
    %7 = vector.load %arg3[%c0_4, %c0_5] : memref<128x32xf32, #tpu.memory_space<vmem>>, vector<128x32xf32>
    %8 = arith.truncf %7 : vector<128x32xf32> to vector<128x32xbf16>
    %c0_6 = arith.constant 0 : index
    %c0_7 = arith.constant 0 : index
    %9 = vector.load %arg5[%c0_6, %c0_7] : memref<32x128xbf16, #tpu.memory_space<vmem>>, vector<32x128xbf16>
    %cst_8 = arith.constant dense<0.000000e+00> : vector<128x128xf32>
    %10 = tpu.matmul %8, %9, %cst_8 {dimension_numbers = #tpu.dot_dimension_numbers<[1], [0], [0], [1], [0, 0, 1, 1], [], []>} : vector<128x32xbf16>, vector<32x128xbf16>, vector<128x128xf32> -> vector<128x128xf32>
    %11 = arith.addf %6, %10 : vector<128x128xf32>
    %12 = math.tanh %11 : vector<128x128xf32>
    %13 = arith.truncf %12 : vector<128x128xf32> to vector<128x128xbf16>
    %c0_9 = arith.constant 0 : index
    %c0_10 = arith.constant 0 : index
    %14 = vector.load %arg6[%c0_9, %c0_10] : memref<1x128xbf16, #tpu.memory_space<vmem>>, vector<1x128xbf16>
    %cst_11 = arith.constant dense<0.000000e+00> : vector<1x128xf32>
    %15 = tpu.matmul %14, %13, %cst_11 {dimension_numbers = #tpu.dot_dimension_numbers<[1], [1], [0], [0], [0, 0, 1, 0], [], []>} : vector<1x128xbf16>, vector<128x128xbf16>, vector<1x128xf32> -> vector<1x128xf32>
    %c0_12 = arith.constant 0 : index
    %c0_13 = arith.constant 0 : index
    %16 = vector.load %arg8[%c0_12, %c0_13] : memref<1x128xf32, #tpu.memory_space<vmem>>, vector<1x128xf32>
    %17 = arith.addf %16, %15 : vector<1x128xf32>
    %c0_14 = arith.constant 0 : index
    %c0_15 = arith.constant 0 : index
    %18 = vector.load %arg8[%c0_14, %c0_15] : memref<1x128xf32, #tpu.memory_space<vmem>>, vector<1x128xf32>
    tpu.vector_store %arg8[%c0_14, %c0_15], %17 {strides = array<i32>} : memref<1x128xf32, #tpu.memory_space<vmem>>, vector<1x128xf32>,
    %c0_i32_16 = arith.constant 0 : i32
    %19 = arith.cmpi eq, %arg1, %c0_i32_16 : i32
    %20 = arith.extui %19 : i1 to i32
    %c0_i32_17 = arith.constant 0 : i32
    %21 = arith.cmpi ne, %20, %c0_i32_17 : i32
    scf.if %21 {
      %c0_18 = arith.constant 0 : index
      %c0_19 = arith.constant 0 : index
      %22 = vector.load %arg8[%c0_18, %c0_19] : memref<1x128xf32, #tpu.memory_space<vmem>>, vector<1x128xf32>
      %c0_20 = arith.constant 0 : index
      %c0_21 = arith.constant 0 : index
      %23 = vector.load %arg7[%c0_20, %c0_21] : memref<1x128xf32, #tpu.memory_space<vmem>>, vector<1x128xf32>
      tpu.vector_store %arg7[%c0_20, %c0_21], %22 {strides = array<i32>} : memref<1x128xf32, #tpu.memory_space<vmem>>, vector<1x128xf32>,
    } else {
    }
    return
  }
  func.func @transform_0(%arg0: i32, %arg1: i32) -> (i32, i32) {
    %c0_i32 = arith.constant 0 : i32
    %c0_i32_0 = arith.constant 0 : i32
    return %arg0, %c0_i32 : i32, i32
  }
  func.func @transform_1(%arg0: i32, %arg1: i32) -> (i32, i32) {
    %c0_i32 = arith.constant 0 : i32
    %c0_i32_0 = arith.constant 0 : i32
    return %arg0, %c0_i32 : i32, i32
  }
  func.func @transform_2(%arg0: i32, %arg1: i32) -> (i32, i32) {
    %c0_i32 = arith.constant 0 : i32
    %c0_i32_0 = arith.constant 0 : i32
    return %c0_i32, %arg1 : i32, i32
  }
  func.func @transform_3(%arg0: i32, %arg1: i32) -> (i32, i32) {
    %c0_i32 = arith.constant 0 : i32
    %c0_i32_0 = arith.constant 0 : i32
    return %c0_i32, %arg1 : i32, i32
  }
  func.func @transform_4(%arg0: i32, %arg1: i32) -> (i32, i32) {
    %c0_i32 = arith.constant 0 : i32
    %c0_i32_0 = arith.constant 0 : i32
    return %c0_i32, %arg1 : i32, i32
  }
  func.func @transform_5(%arg0: i32, %arg1: i32) -> (i32, i32) {
    %c0_i32 = arith.constant 0 : i32
    %c0_i32_0 = arith.constant 0 : i32
    return %c0_i32, %arg0 : i32, i32
  }
}

</mosaic_0001>

<bundles_post_ra>
// kernel: tpu_custom_call.1
= control target key start
LH: loop header
LB: loop body
LE: loop exit
PB: predicated region body
PF: predicated region fallthrough
CT: control target
= control target key end

     0   :  { %10 = vsyncpa [#allocation4], 0  ;;  %s684_s0 = inlined_call_operand.hbm [shape: f32[16,32], index: 0, kind: input, shape index: {}]   ;;  %s685_s1 = inlined_call_operand.hbm [shape: f32[16,32], index: 1, kind: input, shape index: {}]   ;;  %s686_s2 = inlined_call_operand.hbm [shape: bf16[32,128], index: 2, kind: input, shape index: {}]   ;;  %s687_s3 = inlined_call_operand.hbm [shape: bf16[32,128], index: 3, kind: input, shape index: {}]   ;;  %s688_s4 = inlined_call_operand.vmem [shape: bf16[1,128], index: 4, kind: input, shape index: {}]   ;;  %s689_s5 = inlined_call_operand.hbm [shape: f32[1,128], index: 5, kind: output, shape index: {}]  }
   0x1   :  { %11 = vsyncpa [#allocation7], 0 }
   0x2   :  { %12 = vsyncpa [#allocation10], 0 }
   0x3   :  { %13 = vsyncpa [#allocation5], 0 }
   0x4   :  { %17 = vsyncadd [#allocation4], 1792  ;;  %s18_s20 = sshll.u32 %s684_s0, 4  ;;  %s592_s21 = smov [#allocation3]   ;;  %s19_s20 = int_to_ptr.hbm [resolvable:$true] %s18_s20 }
   0x5   :  { %s20_s22 = sshll.u32 %s592_s21, 4  ;;  %s593_s23 = smov 128   ;;  %s21_s22 = int_to_ptr.vmem [resolvable:$true] %s20_s22 }
   0x6   :  { %s594_s24 = smov 8  }
   0x7   :  { %26 = dma.hbm_to_vmem [thread:$0]  %s19_s20, 256, %s21_s22, [#allocation4], %s593_s23, %s593_s23, %s594_s24  }
   0x8   :  { %30 = vsyncadd [#allocation7], 1792  ;;  %s31_s27 = sshll.u32 %s685_s1, 4  ;;  %s595_s28 = smov [#allocation6]   ;;  %s32_s27 = int_to_ptr.hbm [resolvable:$true] %s31_s27 }
   0x9   :  { %s33_s29 = sshll.u32 %s595_s28, 4  ;;  %s44_s0 = sshll.u32 %s686_s2, 4  ;;  %s34_s29 = int_to_ptr.vmem [resolvable:$true] %s33_s29  ;;  %s45_s0 = int_to_ptr.hbm [resolvable:$true] %s44_s0 }
   0xa   :  { %39 = dma.hbm_to_vmem [thread:$0]  %s32_s27, 256, %s34_s29, [#allocation7], %s593_s23, %s593_s23, %s594_s24  }
   0xb   :  { %s596_s7 = smov [#allocation8]   ;;  %s597_s9 = smov 64  }
   0xc   :  { %s46_s8 = sshll.u32 %s596_s7, 4  ;;  %s598_s10 = smov 4   ;;  %s47_s8 = int_to_ptr.vmem [resolvable:$true] %s46_s8 }
   0xd   :  { %52 = dma.hbm_to_vmem [thread:$0]  %s45_s0, 256, %s47_s8, [#allocation7], %s597_s9, %s597_s9, %s598_s10  }
   0xe   :  { %s57_s1 = sshll.u32 %s687_s3, 4  ;;  %s599_s13 = smov [#allocation9]   ;;  %s58_s1 = int_to_ptr.hbm [resolvable:$true] %s57_s1 }
   0xf   :  { %s59_s14 = sshll.u32 %s599_s13, 4  ;;  %s60_s14 = int_to_ptr.vmem [resolvable:$true] %s59_s14 }
  0x10   :  { %65 = dma.hbm_to_vmem [thread:$0]  %s58_s1, 256, %s60_s14, [#allocation10], %s597_s9, %s597_s9, %s598_s10  }
  0x11   :  { %584 = dma.done.wait [#allocation4], 2048  }
  0x12   :  { %585 = vsyncadd [#allocation4], 4294965248 }
  0x13   :  { %586 = dma.done.wait [#allocation7], 2304  }
  0x14   :  { %587 = vsyncadd [#allocation7], 4294964992 }
  0x15   :  { %588 = dma.done.wait [#allocation10], 256  }
  0x16   :  { %589 = vsyncadd [#allocation10], 4294967040  ;;  %v417_v0 = vld [vmem:[#allocation9 + $0x8] sm:$0xff]  ;;  %v415_v1 = vld [vmem:[#allocation8 + $0x8] sm:$0xff]  ;;  %vm158_vm0 = vcmask 261120   ;;  %s601_s15 = smov [#allocation11]  }
  0x17   :  { %v416_v2 = vld [vmem:[#allocation9] sm:$0xff]  ;;  %v118_v3 = vld [vmem:[#allocation6] sm:$0xff]  ;;  %189 = vmatpush.bf16.msra.mxu0 %v417_v0  ;;  %418 = vmatpush.bf16.msra.mxu3 %v417_v0  ;;  %v119_v4 = vld [vmem:[#allocation6 + $0x8] sm:$0xff]  ;;  %s368_s16 = sshll.u32 %s601_s15, 4  ;;  %s370_s19 = sshll.u32 %s689_s5, 4  ;;  %s369_s16 = int_to_ptr.vmem [resolvable:$true] %s368_s16  ;;  %s371_s19 = int_to_ptr.hbm [resolvable:$true] %s370_s19 }
  0x18   :  { %v130_v5 = vld [vmem:[#allocation6 + $0x60] sm:$0xff]  ;;  %v131_v6 = vld [vmem:[#allocation6 + $0x68] sm:$0xff]  ;;  %274 = vmatpush.bf16.msra.mxu1 %v415_v1  ;;  %v134_v10 = vpack.c.bf16 %v119_v4, %v118_v3  ;;  %v120_v13 = vld [vmem:[#allocation6 + $0x10] sm:$0xff] }
  0x19   :  { %v414_v7 = vld [vmem:[#allocation8] sm:$0xff]  ;;  %v91_v9 = vld [vmem:[#allocation3 + $0x8] sm:$0xff]  ;;  %v140_v11 = vpack.c.bf16 %v131_v6, %v130_v5  ;;  %v121_v14 = vld [vmem:[#allocation6 + $0x18] sm:$0xff] }
  0x1a   :  { %v90_v8 = vld [vmem:[#allocation3] sm:$0xff]  ;;  %v132_v15 = vld [vmem:[#allocation6 + $0x70] sm:$0xff]  ;;  %v133_v16 = vld [vmem:[#allocation6 + $0x78] sm:$0xff]  ;;  %v135_v19 = vpack.c.bf16 %v121_v14, %v120_v13 }
  0x1b   :  { %190 = vmatpush.bf16.msra.mxu0 %v416_v2  ;;  %419 = vmatpush.bf16.msra.mxu3 %v416_v2  ;;  %v106_v12 = vpack.c.bf16 %v91_v9, %v90_v8  ;;  %v92_v17 = vld [vmem:[#allocation3 + $0x10] sm:$0xff]  ;;  %v93_v18 = vld [vmem:[#allocation3 + $0x18] sm:$0xff]  ;;  %v141_v20 = vpack.c.bf16 %v133_v16, %v132_v15  ;;  %v122_v22 = vld [vmem:[#allocation6 + $0x20] sm:$0xff] }
  0x1c   :  { %275 = vmatpush.bf16.msra.mxu1 %v414_v7  ;;  %v107_v21 = vpack.c.bf16 %v93_v18, %v92_v17  ;;  %v123_v23 = vld [vmem:[#allocation6 + $0x28] sm:$0xff]  ;;  %v102_v24 = vld [vmem:[#allocation3 + $0x60] sm:$0xff]  ;;  %v124_v31 = vld [vmem:[#allocation6 + $0x30] sm:$0xff] }
  0x1d   :  { %v103_v25 = vld [vmem:[#allocation3 + $0x68] sm:$0xff]  ;;  %v94_v26 = vld [vmem:[#allocation3 + $0x20] sm:$0xff]  ;;  %v136_v28 = vpack.c.bf16 %v123_v23, %v122_v22  ;;  %v125_v32 = vld [vmem:[#allocation6 + $0x38] sm:$0xff] }
  0x1e   :  { %390 = vmatmul.msk.bf16.vlgmr.msra.gmra.mxu0 %vm158_vm0, %v134_v10  ;;  %396 = vmatmul.msk.bf16.vlgmr.msra.gmra.mxu3 %vm158_vm0, %v140_v11  ;;  %v95_v27 = vld [vmem:[#allocation3 + $0x28] sm:$0xff]  ;;  %v112_v29 = vpack.c.bf16 %v103_v25, %v102_v24  ;;  %v104_v33 = vld [vmem:[#allocation3 + $0x70] sm:$0xff]  ;;  %v105_v34 = vld [vmem:[#allocation3 + $0x78] sm:$0xff]  ;;  %v137_v37 = vpack.c.bf16 %v125_v32, %v124_v31 }
  0x1f   :  { %420 = vmatpush.bf16.msrb.mxu3 %v415_v1  ;;  %406 = vmatmul.msk.bf16.vlgmr.msra.gmra.mxu1 %vm158_vm0, %v106_v12  ;;  %v108_v30 = vpack.c.bf16 %v95_v27, %v94_v26  ;;  %v96_v35 = vld [vmem:[#allocation3 + $0x30] sm:$0xff]  ;;  %v97_v36 = vld [vmem:[#allocation3 + $0x38] sm:$0xff]  ;;  %v113_v38 = vpack.c.bf16 %v105_v34, %v104_v33  ;;  %v126_v40 = vld [vmem:[#allocation6 + $0x40] sm:$0xff] }
  0x20   :  { %v109_v39 = vpack.c.bf16 %v97_v36, %v96_v35  ;;  %v127_v41 = vld [vmem:[#allocation6 + $0x48] sm:$0xff]  ;;  %v98_v42 = vld [vmem:[#allocation3 + $0x40] sm:$0xff]  ;;  %v128_v46 = vld [vmem:[#allocation6 + $0x50] sm:$0xff] }
  0x21   :  { %v99_v43 = vld [vmem:[#allocation3 + $0x48] sm:$0xff]  ;;  %v138_v44 = vpack.c.bf16 %v127_v41, %v126_v40  ;;  %v129_v47 = vld [vmem:[#allocation6 + $0x58] sm:$0xff]  ;;  %v100_v48 = vld [vmem:[#allocation3 + $0x50] sm:$0xff] }
  0x22   :  { %v110_v45 = vpack.c.bf16 %v99_v43, %v98_v42  ;;  %v101_v49 = vld [vmem:[#allocation3 + $0x58] sm:$0xff]  ;;  %v139_v50 = vpack.c.bf16 %v129_v47, %v128_v46 }
  0x23   :  { %421 = vmatpush.bf16.msrb.mxu3 %v414_v7  ;;  %v111_v51 = vpack.c.bf16 %v101_v49, %v100_v48 }
  0x2e   :  { %391 = vmatmul.msk.bf16.gmra.mxu0 %vm158_vm0, %v135_v19  ;;  %397 = vmatmul.msk.bf16.gmra.mxu3 %vm158_vm0, %v141_v20 }
  0x2f   :  { %407 = vmatmul.msk.bf16.gmra.mxu1 %vm158_vm0, %v107_v21 }
  0x3e   :  { %392 = vmatmul.msk.bf16.gmra.mxu0 %vm158_vm0, %v136_v28  ;;  %412 = vmatmul.msk.bf16.vlgmr.msrb.gmra.mxu3 %vm158_vm0, %v112_v29 }
  0x3f   :  { %408 = vmatmul.msk.bf16.gmra.mxu1 %vm158_vm0, %v108_v30 }
  0x4e   :  { %393 = vmatmul.msk.bf16.gmra.mxu0 %vm158_vm0, %v137_v37  ;;  %413 = vmatmul.msk.bf16.gmra.mxu3 %vm158_vm0, %v113_v38 }
  0x4f   :  { %409 = vmatmul.msk.bf16.gmra.mxu1 %vm158_vm0, %v109_v39 }
  0x5e   :  { %394 = vmatmul.msk.bf16.gmra.mxu0 %vm158_vm0, %v138_v44 }
  0x5f   :  { %410 = vmatmul.msk.bf16.gmra.mxu1 %vm158_vm0, %v110_v45 }
  0x6e   :  { %395 = vmatmul.msk.bf16.gmra.mxu0 %vm158_vm0, %v139_v50 }
  0x6f   :  { %411 = vmatmul.msk.bf16.gmra.mxu1 %vm158_vm0, %v111_v51 }
  0x9b   :  { %v192_v52 = vpop.f32.mrf.mxu0 }
  0x9c   :  { %v277_v53 = vpop.f32.mrf.mxu1 }
  0x9d   :  { %v278_v54 = vadd.f32 %v277_v53, %v192_v52 }
  0x9f   :  { %432 = vtanh.f32 %v278_v54 }
  0xa1   :  { %v222_v55 = vpop.f32.mrf.mxu3 }
  0xa3   :  { %v194_v56 = vpop.f32.mrf.mxu0 }
  0xa4   :  { %v279_v57 = vpop.f32.mrf.mxu1 }
  0xa5   :  { %v280_v58 = vadd.f32 %v279_v57, %v194_v56  ;;  %v660_v61 = vpop.eup %432 }
  0xa7   :  { %434 = vtanh.f32 %v280_v58 }
  0xa9   :  { %v224_v59 = vpop.f32.mrf.mxu3 }
  0xab   :  { %v197_v60 = vpop.f32.mrf.mxu0 }
  0xac   :  { %v282_v62 = vpop.f32.mrf.mxu1 }
  0xad   :  { %v662_v63 = vpop.eup %434  ;;  %v283_v0 = vadd.f32 %v282_v62, %v197_v60  ;;  %v600_v60 = vmov 0.0   ;;  %v341_v62 = vld [vmem:[%s688_s4] sm:$0x1] }
  0xae   :  { %v333_v1 = vpack.c.bf16 %v662_v63, %v660_v61  ;;  %89 = vst [vmem:[#allocation2] sm:$0x1] %v600_v60 }
  0xaf   :  { %436 = vtanh.f32 %v283_v0 }
  0xb1   :  { %v227_v2 = vpop.f32.mrf.mxu3 }
  0xb3   :  { %v199_v3 = vpop.f32.mrf.mxu0 }
  0xb4   :  { %v284_v4 = vpop.f32.mrf.mxu1 }
  0xb5   :  { %v285_v5 = vadd.f32 %v284_v4, %v199_v3  ;;  %v666_v8 = vpop.eup %436  ;;  %v355_v0 = vld [vmem:[#allocation2] sm:$0x1] }
  0xb7   :  { %438 = vtanh.f32 %v285_v5 }
  0xb9   :  { %v229_v6 = vpop.f32.mrf.mxu3 }
  0xbb   :  { %v202_v7 = vpop.f32.mrf.mxu0 }
  0xbc   :  { %v287_v9 = vpop.f32.mrf.mxu1 }
  0xbd   :  { %v668_v10 = vpop.eup %438  ;;  %v288_v11 = vadd.f32 %v287_v9, %v202_v7 }
  0xbe   :  { %v334_v12 = vpack.c.bf16 %v668_v10, %v666_v8 }
  0xbf   :  { %440 = vtanh.f32 %v288_v11 }
  0xc1   :  { %v307_v13 = vpop.f32.mrf.mxu3 }
  0xc2   :  { %v308_v32 = vadd.f32 %v307_v13, %v222_v55 }
  0xc3   :  { %v204_v14 = vpop.f32.mrf.mxu0 }
  0xc4   :  { %v289_v15 = vpop.f32.mrf.mxu1 }
  0xc5   :  { %v290_v16 = vadd.f32 %v289_v15, %v204_v14  ;;  %v441_v19 = vpop.eup %440 }
  0xc7   :  { %442 = vtanh.f32 %v290_v16 }
  0xc9   :  { %v309_v17 = vpop.f32.mrf.mxu3 }
  0xca   :  { %v310_v31 = vadd.f32 %v309_v17, %v224_v59 }
  0xcb   :  { %v207_v18 = vpop.f32.mrf.mxu0 }
  0xcc   :  { %v292_v20 = vpop.f32.mrf.mxu1 }
  0xcd   :  { %v443_v21 = vpop.eup %442  ;;  %v293_v54 = vadd.f32 %v292_v20, %v207_v18 }
  0xce   :  { %v335_v22 = vpack.c.bf16 %v443_v21, %v441_v19 }
  0xd1   :  { %v312_v23 = vpop.f32.mrf.mxu3 }
  0xd2   :  { %v313_v26 = vadd.f32 %v312_v23, %v227_v2 }
  0xd3   :  { %v209_v24 = vpop.f32.mrf.mxu0 }
  0xd4   :  { %v294_v25 = vpop.f32.mrf.mxu1  ;;  %444 = vtanh.f32 %v313_v26 }
  0xd5   :  { %v295_v52 = vadd.f32 %v294_v25, %v209_v24 }
  0xd9   :  { %v314_v27 = vpop.f32.mrf.mxu3 }
  0xda   :  { %v315_v28 = vadd.f32 %v314_v27, %v229_v6  ;;  %v445_v33 = vpop.eup %444 }
  0xdb   :  { %v212_v29 = vpop.f32.mrf.mxu0 }
  0xdc   :  { %446 = vtanh.f32 %v315_v28  ;;  %v297_v30 = vpop.f32.mrf.mxu1 }
  0xdd   :  { %448 = vtanh.f32 %v310_v31  ;;  %v298_v48 = vadd.f32 %v297_v30, %v212_v29 }
  0xde   :  { %450 = vtanh.f32 %v308_v32 }
  0xe2   :  { %v447_v34 = vpop.eup %446 }
  0xe3   :  { %v214_v35 = vpop.f32.mrf.mxu0  ;;  %v340_v36 = vpack.c.bf16 %v447_v34, %v445_v33  ;;  %v449_v38 = vpop.eup %448 }
  0xe4   :  { %v299_v37 = vpop.f32.mrf.mxu1  ;;  %v451_v39 = vpop.eup %450 }
  0xe5   :  { %342 = vmatpush.bf16.xpose.msra.mxu2 %v340_v36  ;;  %v339_v41 = vpack.c.bf16 %v449_v38, %v451_v39  ;;  %v300_v47 = vadd.f32 %v299_v37, %v214_v35 }
  0xeb   :  { %v217_v40 = vpop.f32.mrf.mxu0 }
  0xec   :  { %v302_v42 = vpop.f32.mrf.mxu1 }
  0xed   :  { %343 = vmatpush.bf16.xpose.msra.mxu2 %v339_v41  ;;  %v303_v43 = vadd.f32 %v302_v42, %v217_v40 }
  0xef   :  { %452 = vtanh.f32 %v303_v43 }
  0xf3   :  { %v219_v44 = vpop.f32.mrf.mxu0 }
  0xf4   :  { %v304_v45 = vpop.f32.mrf.mxu1 }
  0xf5   :  { %v305_v46 = vadd.f32 %v304_v45, %v219_v44  ;;  %v453_v49 = vpop.eup %452 }
  0xf7   :  { %454 = vtanh.f32 %v305_v46 }
  0xf8   :  { %456 = vtanh.f32 %v300_v47 }
  0xf9   :  { %458 = vtanh.f32 %v298_v48 }
  0xfa   :  { %460 = vtanh.f32 %v295_v52 }
  0xfb   :  { %462 = vtanh.f32 %v293_v54 }
  0xfd   :  { %v455_v50 = vpop.eup %454 }
  0xfe   :  { %v338_v51 = vpack.c.bf16 %v455_v50, %v453_v49  ;;  %v457_v53 = vpop.eup %456 }
  0xff   :  { %v459_v55 = vpop.eup %458 }
 0x100   :  { %344 = vmatpush.bf16.xpose.msra.mxu2 %v338_v51  ;;  %v337_v56 = vpack.c.bf16 %v457_v53, %v459_v55  ;;  %v461_v57 = vpop.eup %460 }
 0x101   :  { %v463_v58 = vpop.eup %462 }
 0x102   :  { %v336_v59 = vpack.c.bf16 %v461_v57, %v463_v58 }
 0x108   :  { %345 = vmatpush.bf16.xpose.msra.mxu2 %v337_v56 }
 0x110   :  { %346 = vmatpush.bf16.xpose.msra.mxu2 %v336_v59 }
 0x118   :  { %347 = vmatpush.bf16.xpose.msra.mxu2 %v335_v22 }
 0x120   :  { %348 = vmatpush.bf16.xpose.msra.mxu2 %v334_v12 }
 0x128   :  { %349 = vmatpush.bf16.xpose.msra.mxu2 %v333_v1 }
 0x12f   :  { %350 = vmatmul.bf16.vlgmr.msra.gmra.mxu2 %v341_v62 }
 0x1b2   :  { %v351_v2 = vpop.f32.mrf.mxu2 }
 0x1b3   :  { %v356_v3 = vadd.f32 %v355_v0, %v351_v2 }
 0x1b5   :  { %357 = vst [vmem:[#allocation2] sm:$0x1] %v356_v3 }
 0x1ba   :  { %v353_v4 = vpop.f32.mrf.mxu2 }
 0x1bc   :  { %v361_v61 = vld [vmem:[#allocation2] sm:$0x1] }
 0x1bd   :  { %362 = vst [vmem:[#allocation11] sm:$0x1] %v361_v61 }
 0x1be   :  { %373 = dma.vmem_to_hbm [thread:$0]  %s369_s16, 16, %s371_s19, [#allocation5]  }
 0x1bf   :  { %590 = dma.done.wait [#allocation5], 16  }
 0x1c0   :  { %591 = vsyncadd [#allocation5], 4294967280 }
 0x1c1   :  { %378 = vsyncpa [#allocation4], 1 }
 0x1c2   :  { %379 = vsyncpa [#allocation7], 1 }
 0x1c3   :  { %380 = vsyncpa [#allocation10], 1 }
 0x1c4   :  { %381 = vsyncpa [#allocation5], 1 }

</bundles_post_ra>
